<compile_context>
chip_gen: v5e
topology: v5e:2x2
jax: 0.10.0
libtpu: 0.0.40
codegen_flags: <defaults>
</compile_context>

<pallas_src>
import functools

import jax
import jax.numpy as jnp
from jax import lax
from jax.experimental import pallas as pl
from jax.experimental.pallas import tpu as pltpu

LANE = 128


def _round_up(x, m):
    return (x + m - 1) // m * m


def _vmem_capacity_bytes():
    try:
        info = pltpu.get_tpu_info()
        for attr in ("vmem_capacity_bytes", "vmem_size_bytes", "vmem_bytes"):
            v = getattr(info, attr, None)
            if v:
                return int(v)
    except Exception:
        pass
    return 64 << 20  # conservative: v7x per-TensorCore VMEM


# -----------------------------------------------------------------------------
# Pass 1: conv as kh accumulating (rows*Wo, kw*Cin) x (kw*Cin, tn) MXU matmuls,
# fused with per-tile channel sum / sum-of-squares for BatchNorm statistics.
# The GEMM is computed exactly once; y is written to HBM for the cheap pass 2.
# -----------------------------------------------------------------------------
def _conv_stats_kernel(x_ref, w_ref, y_ref, psum_ref, psq_ref):
    # x_ref : (th, kh, Wo, kw*Cin)  activation taps (pure reshape of NHWC)
    # w_ref : (kh, kw*Cin, tn)      weight taps for this Cout tile
    # y_ref : (th*Wo, tn)           pre-BN conv output for this tile
    # psum/psq_ref : (1, 1, tn)     partial channel sums / sums of squares
    kh = x_ref.shape[1]
    m, tn = y_ref.shape
    kwcin = x_ref.shape[-1]

    acc = jnp.zeros((m, tn), jnp.float32)
    for i in range(kh):  # kh is tiny (1 or 2 for TransEncoder's convs)
        xi = x_ref[:, i, :, :].reshape(m, kwcin)
        acc = acc + jnp.dot(xi, w_ref[i], preferred_element_type=jnp.float32)

    y_ref[...] = acc.astype(y_ref.dtype)
    psum_ref[...] = jnp.sum(acc, axis=0).reshape(1, 1, tn)
    psq_ref[...] = jnp.sum(acc * acc, axis=0).reshape(1, 1, tn)


# -----------------------------------------------------------------------------
# Pass 2: purely elementwise folded-BN affine + ReLU streamed over y.
# -----------------------------------------------------------------------------
def _bn_act_kernel(y_ref, scale_ref, shift_ref, o_ref, *, activation):
    y = y_ref[...].astype(jnp.float32)
    y = y * scale_ref[...] + shift_ref[...]
    if activation:
        y = jnp.maximum(y, 0.0)
    o_ref[...] = y.astype(o_ref.dtype)


# -----------------------------------------------------------------------------
# Activation -> tap layout (N*Ho, kh, Wo, kw*Cin).
# -----------------------------------------------------------------------------
def _to_taps(x_nhwc, kh, kw, stride, padding):
    n, h, w, c = x_nhwc.shape
    if kh == kw == stride and padding == 0:
        # Non-overlapping patches (every ConvBNReLU / Conv2dReLU layer in
        # TransEncoder: 2x2/s2 and 1x1/s1): space-to-depth is a PURE RESHAPE of
        # the row-major NHWC buffer -> no materialized im2col, no HBM blow-up.
        ho, wo = h // kh, w // kw
        return x_nhwc.reshape(n * ho, kh, wo, kw * c), (n, ho, wo)
    # TODO(synk): general overlapping kernels should use halo'd BlockSpecs with
    # in-kernel shifted matmuls; this XLA fallback materializes the kh*kw taps
    # and is only hit for configs TransEncoder never instantiates.
    xp = jnp.pad(x_nhwc, ((0, 0), (padding, padding), (padding, padding), (0, 0)))
    hp, wp = h + 2 * padding, w + 2 * padding
    ho = (hp - kh) // stride + 1
    wo = (wp - kw) // stride + 1
    rows = []
    for i in range(kh):
        cols = [xp[:, i:i + (ho - 1) * stride + 1:stride,
                   j:j + (wo - 1) * stride + 1:stride, :] for j in range(kw)]
        rows.append(jnp.stack(cols, axis=3))          # (N, Ho, Wo, kw, C)
    taps = jnp.stack(rows, axis=2)                    # (N, Ho, kh, Wo, kw, C)
    return taps.reshape(n * ho, kh, wo, kw * c), (n, ho, wo)


# -----------------------------------------------------------------------------
# Wrapper.
# -----------------------------------------------------------------------------
def conv_bn_relu(x_nchw, weight_oihw, gamma, beta, *, stride=1, padding=0,
                 eps=1e-5, activation=True, block_rows=None,
                 compute_dtype=jnp.bfloat16, out_dtype=jnp.float32,
                 out_format="NCHW", return_stats=False):
    c_out, c_in, kh, kw = weight_oihw.shape
    assert kh == kw, "ConvBNReLU uses square kernels"

    # NCHW -> NHWC boundary transpose (pure glue; disappears when the whole
    # network is kept NHWC end-to-end).
    x_nhwc = jnp.transpose(x_nchw, (0, 2, 3, 1))
    taps, (n, ho, wo) = _to_taps(x_nhwc, kh, kw, stride, padding)
    rows_total = n * ho
    kwcin = kw * c_in

    # Lane-dense output channels; 256-wide Cout tiles when possible (v6e/v7x
    # MXUs are 2x256x256), otherwise 128 (v5e-friendly / small layers).
    c_pad = _round_up(c_out, LANE)
    tn = 256 if c_pad % 256 == 0 else LANE
    nc = c_pad // tn

    in_b = jnp.dtype(compute_dtype).itemsize
    y_dtype = compute_dtype            # bf16 intermediate in the bf16 path
    y_b = jnp.dtype(y_dtype).itemsize
    out_b = jnp.dtype(out_dtype).itemsize

    # Row-tile (over N*Ho) sized so the double-buffered x/w/y blocks fit a
    # per-chip VMEM budget; th kept a multiple of 8 so the flattened
    # (th*Wo, tn) blocks remain (8,128)-aligned.
    vmem_cap = _vmem_capacity_bytes()
    budget = min(vmem_cap // 4, 16 << 20)
    per_row = 2 * kh * wo * kwcin * in_b + wo * tn * (2 * y_b + 2 * out_b + 4)
    fixed = 2 * kh * kwcin * tn * in_b + (64 << 10)
    th = max(8, (max(budget - fixed, 0) // max(per_row, 1)) // 8 * 8)
    th = min(th, max(8, (4096 // max(wo, 1)) // 8 * 8))
    if block_rows is not None:
        th = min(th, max(8, (block_rows // max(wo, 1)) // 8 * 8))
    th = min(th, _round_up(rows_total, 8))
    rows_pad = _round_up(rows_total, th)
    nr = rows_pad // th
    r2 = rows_pad * wo                                # padded flat output rows

    # Zero-pad the row axis: padded rows produce y == 0 (no bias), so they
    # contribute nothing to sum/sumsq; dividing by the true count keeps the
    # batch statistics unbiased.
    taps = jnp.pad(taps, ((0, rows_pad - rows_total), (0, 0), (0, 0), (0, 0)))
    taps = taps.astype(compute_dtype)
    w_taps = jnp.transpose(weight_oihw, (2, 3, 1, 0)).reshape(kh, kwcin, c_out)
    w_taps = jnp.pad(w_taps, ((0, 0), (0, 0), (0, c_pad - c_out)))
    w_taps = w_taps.astype(compute_dtype)

    est1 = (2 * (th * kh * wo * kwcin * in_b + kh * kwcin * tn * in_b
                 + th * wo * tn * y_b) + th * wo * tn * 4 + 4 * tn * 8)
    est2 = 2 * th * wo * tn * (y_b + out_b) + 4 * tn * 4
    vmem_limit = int(min(vmem_cap * 3 // 4, max(32 << 20, 2 * max(est1, est2))))

    gemm_flops = 2 * r2 * kh * kwcin * c_pad
    x_bytes = taps.size * in_b
    w_bytes = w_taps.size * in_b

    # ---- Pass 1: conv GEMM (computed once) + partial BN statistics ----------
    y2d, psum, psq = pl.pallas_call(
        _conv_stats_kernel,
        out_shape=(jax.ShapeDtypeStruct((r2, c_pad), y_dtype),
                   jax.ShapeDtypeStruct((nr, 1, c_pad), jnp.float32),
                   jax.ShapeDtypeStruct((nr, 1, c_pad), jnp.float32)),
        grid=(nr, nc),
        in_specs=[
            pl.BlockSpec((th, kh, wo, kwcin), lambda r, c: (r, 0, 0, 0)),
            pl.BlockSpec((kh, kwcin, tn), lambda r, c: (0, 0, c)),
        ],
        out_specs=(
            pl.BlockSpec((th * wo, tn), lambda r, c: (r, c)),
            pl.BlockSpec((1, 1, tn), lambda r, c: (r, 0, c)),
            pl.BlockSpec((1, 1, tn), lambda r, c: (r, 0, c)),
        ),
        compiler_params=pltpu.CompilerParams(
            dimension_semantics=("parallel", "parallel"),
            vmem_limit_bytes=vmem_limit),
        cost_estimate=pl.CostEstimate(
            flops=gemm_flops + 4 * r2 * c_pad,
            transcendentals=0,
            bytes_accessed=x_bytes + nr * w_bytes + r2 * c_pad * y_b
            + 2 * nr * c_pad * 4),
    )(taps, w_taps)

    # ---- Fold BN into per-channel scale/shift (tiny O(nr*Cout) XLA glue) ----
    count = float(rows_total * wo)
    ssum = jnp.sum(psum, axis=(0, 1))[:c_out]
    ssq = jnp.sum(psq, axis=(0, 1))[:c_out]
    mean = ssum / count
    # TODO(synk): E[y^2]-E[y]^2 in f32 can lose precision for large per-channel
    # means; switch to per-tile-centered (Chan/Welford) merging if these stats
    # feed training.
    var = jnp.maximum(ssq / count - mean * mean, 0.0)
    inv = lax.rsqrt(var + eps)
    scale = gamma.astype(jnp.float32) * inv
    shift = beta.astype(jnp.float32) - mean * scale
    scale_p = jnp.pad(scale, (0, c_pad - c_out)).reshape(1, c_pad)
    shift_p = jnp.pad(shift, (0, c_pad - c_out)).reshape(1, c_pad)

    # ---- Pass 2: elementwise affine + ReLU stream over y (in-place when
    #      the dtypes allow aliasing) ------------------------------------------
    aliases = {0: 0} if jnp.dtype(y_dtype) == jnp.dtype(out_dtype) else {}
    out2d = pl.pallas_call(
        functools.partial(_bn_act_kernel, activation=activation),
        out_shape=jax.ShapeDtypeStruct((r2, c_pad), out_dtype),
        grid=(nr, nc),
        in_specs=[
            pl.BlockSpec((th * wo, tn), lambda r, c: (r, c)),
            pl.BlockSpec((1, tn), lambda r, c: (0, c)),
            pl.BlockSpec((1, tn), lambda r, c: (0, c)),
        ],
        out_specs=pl.BlockSpec((th * wo, tn), lambda r, c: (r, c)),
        compiler_params=pltpu.CompilerParams(
            dimension_semantics=("parallel", "parallel"),
            vmem_limit_bytes=vmem_limit),
        cost_estimate=pl.CostEstimate(
            flops=3 * r2 * c_pad,
            transcendentals=0,
            bytes_accessed=r2 * c_pad * (y_b + out_b) + 2 * c_pad * 4),
        input_output_aliases=aliases,
    )(y2d, scale_p, shift_p)

    out = out2d[: n * ho * wo, :c_out].reshape(n, ho, wo, c_out)
    if out_format == "NCHW":
        out = jnp.transpose(out, (0, 3, 1, 2))
    if return_stats:
        # Batch mean/var so the caller can update BatchNorm running statistics.
        return out, mean, var
    return out


# -----------------------------------------------------------------------------
# Pure-JAX reference (conv -> training-mode BN -> ReLU, NCHW).
# -----------------------------------------------------------------------------
def reference(x_nchw, weight_oihw, gamma, beta, *, stride=1, padding=0,
              eps=1e-5, activation=True):
    y = lax.conv_general_dilated(
        x_nchw, weight_oihw,
        window_strides=(stride, stride),
        padding=[(padding, padding), (padding, padding)],
        dimension_numbers=("NCHW", "OIHW", "NCHW"))
    mean = jnp.mean(y, axis=(0, 2, 3), keepdims=True)
    var = jnp.mean((y - mean) ** 2, axis=(0, 2, 3), keepdims=True)
    y = (y - mean) * lax.rsqrt(var + eps)
    y = y * gamma.reshape(1, -1, 1, 1) + beta.reshape(1, -1, 1, 1)
    if activation:
        y = jnp.maximum(y, 0.0)
    return y


if __name__ == "__main__":
    key = jax.random.PRNGKey(0)
    kx, kw2, kw1, kw3, kg, kb = jax.random.split(key, 6)

    N, C_IN, C_OUT, H, W = 2, 4, 8, 16, 16
    x = jax.random.normal(kx, (N, C_IN, H, W), dtype=jnp.float32)
    gamma = jax.random.normal(kg, (C_OUT,), dtype=jnp.float32) * 0.1 + 1.0
    beta = jax.random.normal(kb, (C_OUT,), dtype=jnp.float32) * 0.1

    # --- ConvBNReLU(C, 2C, 2, 2, padding=0): TransEncoder downlayers/down_end.
    w2 = jax.random.normal(kw2, (C_OUT, C_IN, 2, 2), dtype=jnp.float32) * 0.2
    ref2 = jax.block_until_ready(reference(x, w2, gamma, beta, stride=2, padding=0))

    # f32 GEMM operands (tight check); block_rows=64 forces multiple row tiles
    # so the partial-stats reduction and the pipelined path are exercised.
    fn_f32 = jax.jit(functools.partial(
        conv_bn_relu, stride=2, padding=0, activation=True, block_rows=64,
        compute_dtype=jnp.float32))
    out_f32 = jax.block_until_ready(fn_f32(x, w2, gamma, beta))
    assert out_f32.shape == (N, C_OUT, H // 2, W // 2), out_f32.shape
    assert jnp.allclose(out_f32, ref2, atol=1e-4, rtol=1e-4), \
        float(jnp.max(jnp.abs(out_f32 - ref2)))

    # Default bf16 GEMM operands (MXU-native on v5e/v6e/v7x), f32 accumulation.
    fn_bf16 = jax.jit(functools.partial(
        conv_bn_relu, stride=2, padding=0, activation=True, block_rows=64))
    out_bf16 = jax.block_until_ready(fn_bf16(x, w2, gamma, beta))
    assert jnp.allclose(out_bf16, ref2, atol=5e-2, rtol=5e-2), \
        float(jnp.max(jnp.abs(out_bf16 - ref2)))

    # --- Conv2dReLU(128, 256, kernel_size=1, padding=0) analog: 1x1 conv+BN+ReLU.
    w1 = jax.random.normal(kw1, (C_OUT, C_IN, 1, 1), dtype=jnp.float32) * 0.2
    ref1 = jax.block_until_ready(reference(x, w1, gamma, beta, stride=1, padding=0))
    fn_1x1 = jax.jit(functools.partial(
        conv_bn_relu, stride=1, padding=0, activation=True, block_rows=128,
        compute_dtype=jnp.float32))
    out_1x1 = jax.block_until_ready(fn_1x1(x, w1, gamma, beta))
    assert out_1x1.shape == (N, C_OUT, H, W), out_1x1.shape
    assert jnp.allclose(out_1x1, ref1, atol=1e-4, rtol=1e-4), \
        float(jnp.max(jnp.abs(out_1x1 - ref1)))

    # --- General overlapping-kernel fallback (3x3/s1/p1, the class default).
    w3 = jax.random.normal(kw3, (C_OUT, C_IN, 3, 3), dtype=jnp.float32) * 0.1
    ref3 = jax.block_until_ready(reference(x, w3, gamma, beta, stride=1, padding=1))
    fn_3x3 = jax.jit(functools.partial(
        conv_bn_relu, stride=1, padding=1, activation=True, block_rows=128,
        compute_dtype=jnp.float32))
    out_3x3 = jax.block_until_ready(fn_3x3(x, w3, gamma, beta))
    assert jnp.allclose(out_3x3, ref3, atol=1e-4, rtol=1e-4), \
        float(jnp.max(jnp.abs(out_3x3 - ref3)))

    print("KERNEL_OK")
</pallas_src>

<mosaic_0001>
module attributes {stable_mosaic.version = 11 : i64} {
  func.func @_conv_stats_kernel(%arg0: i32, %arg1: i32, %arg2: memref<8x2x8x8xf32, #tpu.memory_space<vmem>>, %arg3: memref<2x8x128xf32, #tpu.memory_space<vmem>>, %arg4: memref<64x128xf32, #tpu.memory_space<vmem>>, %arg5: memref<1x1x128xf32, #tpu.memory_space<vmem>>, %arg6: memref<1x1x128xf32, #tpu.memory_space<vmem>>) attributes {dimension_semantics = [#tpu.dimension_semantics<parallel>, #tpu.dimension_semantics<parallel>], iteration_bounds = array<i64: 2, 1>, scalar_prefetch = 0 : i64, scratch_operands = 0 : i64, tpu.core_type = #tpu.core_type<tc>, window_params = [{transform_indices = @transform_0, window_bounds = array<i64: 8, 2, 8, 8>}, {transform_indices = @transform_1, window_bounds = array<i64: 2, 8, 128>}, {transform_indices = @transform_2, window_bounds = array<i64: 64, 128>}, {transform_indices = @transform_3, window_bounds = array<i64: 1, 1, 128>}, {transform_indices = @transform_4, window_bounds = array<i64: 1, 1, 128>}]} {
    %cst = arith.constant 0.000000e+00 : f32
    %0 = vector.broadcast %cst : f32 to vector<64x128xf32>
    %c0 = arith.constant 0 : index
    %c0_0 = arith.constant 0 : index
    %c0_1 = arith.constant 0 : index
    %c0_2 = arith.constant 0 : index
    %1 = vector.load %arg2[%c0, %c0_0, %c0_1, %c0_2] : memref<8x2x8x8xf32, #tpu.memory_space<vmem>>, vector<8x1x8x8xf32>
    %2 = vector.shape_cast %1 : vector<8x1x8x8xf32> to vector<8x8x8xf32>
    %3 = vector.shape_cast %2 : vector<8x8x8xf32> to vector<64x8xf32>
    %c0_3 = arith.constant 0 : index
    %c0_4 = arith.constant 0 : index
    %c0_5 = arith.constant 0 : index
    %4 = vector.load %arg3[%c0_3, %c0_4, %c0_5] : memref<2x8x128xf32, #tpu.memory_space<vmem>>, vector<1x8x128xf32>
    %5 = vector.shape_cast %4 : vector<1x8x128xf32> to vector<8x128xf32>
    %cst_6 = arith.constant dense<0.000000e+00> : vector<64x128xf32>
    %6 = tpu.matmul %3, %5, %cst_6 {dimension_numbers = #tpu.dot_dimension_numbers<[1], [0], [0], [1], [0, 0, 1, 1], [], []>} : vector<64x8xf32>, vector<8x128xf32>, vector<64x128xf32> -> vector<64x128xf32>
    %7 = arith.addf %0, %6 : vector<64x128xf32>
    %c0_7 = arith.constant 0 : index
    %c1 = arith.constant 1 : index
    %c0_8 = arith.constant 0 : index
    %c0_9 = arith.constant 0 : index
    %8 = vector.load %arg2[%c0_7, %c1, %c0_8, %c0_9] : memref<8x2x8x8xf32, #tpu.memory_space<vmem>>, vector<8x1x8x8xf32>
    %9 = vector.shape_cast %8 : vector<8x1x8x8xf32> to vector<8x8x8xf32>
    %10 = vector.shape_cast %9 : vector<8x8x8xf32> to vector<64x8xf32>
    %c1_10 = arith.constant 1 : index
    %c0_11 = arith.constant 0 : index
    %c0_12 = arith.constant 0 : index
    %11 = vector.load %arg3[%c1_10, %c0_11, %c0_12] : memref<2x8x128xf32, #tpu.memory_space<vmem>>, vector<1x8x128xf32>
    %12 = vector.shape_cast %11 : vector<1x8x128xf32> to vector<8x128xf32>
    %cst_13 = arith.constant dense<0.000000e+00> : vector<64x128xf32>
    %13 = tpu.matmul %10, %12, %cst_13 {dimension_numbers = #tpu.dot_dimension_numbers<[1], [0], [0], [1], [0, 0, 1, 1], [], []>} : vector<64x8xf32>, vector<8x128xf32>, vector<64x128xf32> -> vector<64x128xf32>
    %14 = arith.addf %7, %13 : vector<64x128xf32>
    %c0_14 = arith.constant 0 : index
    %c0_15 = arith.constant 0 : index
    %15 = vector.load %arg4[%c0_14, %c0_15] : memref<64x128xf32, #tpu.memory_space<vmem>>, vector<64x128xf32>
    tpu.vector_store %arg4[%c0_14, %c0_15], %14 {strides = array<i32>} : memref<64x128xf32, #tpu.memory_space<vmem>>, vector<64x128xf32>,
    %cst_16 = arith.constant dense<0.000000e+00> : vector<128xf32>
    %16 = vector.multi_reduction <add>, %14, %cst_16 [0] : vector<64x128xf32> to vector<128xf32>
    %17 = vector.shape_cast %16 : vector<128xf32> to vector<1x1x128xf32>
    %c0_17 = arith.constant 0 : index
    %c0_18 = arith.constant 0 : index
    %c0_19 = arith.constant 0 : index
    %18 = vector.load %arg5[%c0_17, %c0_18, %c0_19] : memref<1x1x128xf32, #tpu.memory_space<vmem>>, vector<1x1x128xf32>
    tpu.vector_store %arg5[%c0_17, %c0_18, %c0_19], %17 {strides = array<i32>} : memref<1x1x128xf32, #tpu.memory_space<vmem>>, vector<1x1x128xf32>,
    %19 = arith.mulf %14, %14 : vector<64x128xf32>
    %cst_20 = arith.constant dense<0.000000e+00> : vector<128xf32>
    %20 = vector.multi_reduction <add>, %19, %cst_20 [0] : vector<64x128xf32> to vector<128xf32>
    %21 = vector.shape_cast %20 : vector<128xf32> to vector<1x1x128xf32>
    %c0_21 = arith.constant 0 : index
    %c0_22 = arith.constant 0 : index
    %c0_23 = arith.constant 0 : index
    %22 = vector.load %arg6[%c0_21, %c0_22, %c0_23] : memref<1x1x128xf32, #tpu.memory_space<vmem>>, vector<1x1x128xf32>
    tpu.vector_store %arg6[%c0_21, %c0_22, %c0_23], %21 {strides = array<i32>} : memref<1x1x128xf32, #tpu.memory_space<vmem>>, vector<1x1x128xf32>,
    return
  }
  func.func @transform_0(%arg0: i32, %arg1: i32) -> (i32, i32, i32, i32) {
    %c0_i32 = arith.constant 0 : i32
    %c0_i32_0 = arith.constant 0 : i32
    %c0_i32_1 = arith.constant 0 : i32
    %c0_i32_2 = arith.constant 0 : i32
    return %arg0, %c0_i32, %c0_i32_0, %c0_i32_1 : i32, i32, i32, i32
  }
  func.func @transform_1(%arg0: i32, %arg1: i32) -> (i32, i32, i32) {
    %c0_i32 = arith.constant 0 : i32
    %c0_i32_0 = arith.constant 0 : i32
    %c0_i32_1 = arith.constant 0 : i32
    return %c0_i32, %c0_i32_0, %arg1 : i32, i32, i32
  }
  func.func @transform_2(%arg0: i32, %arg1: i32) -> (i32, i32) {
    %c0_i32 = arith.constant 0 : i32
    return %arg0, %arg1 : i32, i32
  }
  func.func @transform_3(%arg0: i32, %arg1: i32) -> (i32, i32, i32) {
    %c0_i32 = arith.constant 0 : i32
    %c0_i32_0 = arith.constant 0 : i32
    return %arg0, %c0_i32, %arg1 : i32, i32, i32
  }
  func.func @transform_4(%arg0: i32, %arg1: i32) -> (i32, i32, i32) {
    %c0_i32 = arith.constant 0 : i32
    %c0_i32_0 = arith.constant 0 : i32
    return %arg0, %c0_i32, %arg1 : i32, i32, i32
  }
}

module attributes {stable_mosaic.version = 11 : i64} {
  func.func @_bn_act_kernel(%arg0: i32, %arg1: i32, %arg2: memref<64x128xf32, #tpu.memory_space<vmem>>, %arg3: memref<1x128xf32, #tpu.memory_space<vmem>>, %arg4: memref<1x128xf32, #tpu.memory_space<vmem>>, %arg5: memref<64x128xf32, #tpu.memory_space<vmem>>) attributes {dimension_semantics = [#tpu.dimension_semantics<parallel>, #tpu.dimension_semantics<parallel>], iteration_bounds = array<i64: 2, 1>, scalar_prefetch = 0 : i64, scratch_operands = 0 : i64, tpu.core_type = #tpu.core_type<tc>, window_params = [{transform_indices = @transform_0, window_bounds = array<i64: 64, 128>}, {transform_indices = @transform_1, window_bounds = array<i64: 1, 128>}, {transform_indices = @transform_2, window_bounds = array<i64: 1, 128>}, {transform_indices = @transform_3, window_bounds = array<i64: 64, 128>}]} {
    %c0 = arith.constant 0 : index
    %c0_0 = arith.constant 0 : index
    %0 = vector.load %arg2[%c0, %c0_0] : memref<64x128xf32, #tpu.memory_space<vmem>>, vector<64x128xf32>
    %c0_1 = arith.constant 0 : index
    %c0_2 = arith.constant 0 : index
    %1 = vector.load %arg3[%c0_1, %c0_2] : memref<1x128xf32, #tpu.memory_space<vmem>>, vector<1x128xf32>
    %2 = vector.broadcast %1 : vector<1x128xf32> to vector<64x128xf32>
    %3 = arith.mulf %0, %2 : vector<64x128xf32>
    %c0_3 = arith.constant 0 : index
    %c0_4 = arith.constant 0 : index
    %4 = vector.load %arg4[%c0_3, %c0_4] : memref<1x128xf32, #tpu.memory_space<vmem>>, vector<1x128xf32>
    %5 = vector.broadcast %4 : vector<1x128xf32> to vector<64x128xf32>
    %6 = arith.addf %3, %5 : vector<64x128xf32>
    %cst = arith.constant 0.000000e+00 : f32
    %7 = vector.broadcast %cst : f32 to vector<64x128xf32>
    %8 = arith.maximumf %6, %7 : vector<64x128xf32>
    %c0_5 = arith.constant 0 : index
    %c0_6 = arith.constant 0 : index
    %9 = vector.load %arg5[%c0_5, %c0_6] : memref<64x128xf32, #tpu.memory_space<vmem>>, vector<64x128xf32>
    tpu.vector_store %arg5[%c0_5, %c0_6], %8 {strides = array<i32>} : memref<64x128xf32, #tpu.memory_space<vmem>>, vector<64x128xf32>,
    return
  }
  func.func @transform_0(%arg0: i32, %arg1: i32) -> (i32, i32) {
    %c0_i32 = arith.constant 0 : i32
    return %arg0, %arg1 : i32, i32
  }
  func.func @transform_1(%arg0: i32, %arg1: i32) -> (i32, i32) {
    %c0_i32 = arith.constant 0 : i32
    %c0_i32_0 = arith.constant 0 : i32
    return %c0_i32, %arg1 : i32, i32
  }
  func.func @transform_2(%arg0: i32, %arg1: i32) -> (i32, i32) {
    %c0_i32 = arith.constant 0 : i32
    %c0_i32_0 = arith.constant 0 : i32
    return %c0_i32, %arg1 : i32, i32
  }
  func.func @transform_3(%arg0: i32, %arg1: i32) -> (i32, i32) {
    %c0_i32 = arith.constant 0 : i32
    return %arg0, %arg1 : i32, i32
  }
}

</mosaic_0001>

<bundles_post_ra>
// kernel: conv_bn_relu.3
= control target key start
LH: loop header
LB: loop body
LE: loop exit
PB: predicated region body
PF: predicated region fallthrough
CT: control target
= control target key end

     0   :  { %s466_s12 = smov 0   ;;  %s468_s13 = smov 0   ;;  %s505_s0 = inlined_call_operand.vmem [shape: f32[128,128], index: 0, kind: input, shape index: {}, may-alias: {0,3}]   ;;  %s506_s1 = inlined_call_operand.vmem [shape: f32[1,128], index: 1, kind: input, shape index: {}]   ;;  %s507_s2 = inlined_call_operand.vmem [shape: f32[1,128], index: 2, kind: input, shape index: {}]   ;;  %s508_s3 = inlined_call_operand.vmem [shape: f32[128,128], index: 3, kind: output, shape index: {}, may-alias: {0,3}]  }
   0x1   :  { %s470_s14 = smov 0  }
   0x2 LB: > { %s25_s15 = sadd.s32 1, %s440_s13  ;;  %p389_p0 = scmp.ge.s32.totalorder %s444_s14, 1  ;;  %s444_s14 = sphi %s470_s14, %s13_s14   ;;  %s440_s13 = sphi %s468_s13, %s510_s13   ;;  %s436_s12 = sphi %s466_s12, %s509_s12  }
   0x3   : > { %p27_p1 = scmp.ge.s32.totalorder %s25_s15, 2  ;;  %p173_p2 = scmp.lt.s32.totalorder %s444_s14, 3 }
   0x5   : > { %s512_s15 = smov (%p27_p1, %s25_s15), 0  ;;  %p174_p3 = pnand %p389_p0, %p173_p2 }
   0x6   : > { %s390_s16 = sshll.u32 (!%p174_p3), %s436_s12, 3 }
   0x7   : > { %177 = sbr.rel (%p174_p3) target bundleno = 30 (0x1e), region = 32  ;;  %p210_p4 = scmp.lt.s32.totalorder (!%p174_p3), %s390_s16, 15 }
   0xc   : > { %s514_s16 = smov (!%p210_p4, %s390_s16), 15  ;;  %v420_v0 = vld [vmem:[%s506_s1] ss:$0 sm:$0xff] }
   0xd   : > { %s391_s19 = sshll.u32 %s514_s16, 3  ;;  %v421_v1 = vld [vmem:[%s507_s2] ss:$0 sm:$0xff] }
   0xe   : > { %s216_s22 = scalar_lea.vmem %s505_s0, %s391_s19  ;;  %s231_s27 = scalar_lea.vmem %s508_s3, %s391_s19 }
   0xf   : > { %v233_v2 = vld [vmem:[%s216_s22] sm:$0xff]  ;;  %v234_v3 = vld [vmem:[%s216_s22 + $0x8] sm:$0xff]  ;;  %v235_v4 = vld [vmem:[%s216_s22 + $0x10] sm:$0xff] }
  0x10   : > { %v236_v5 = vld [vmem:[%s216_s22 + $0x18] sm:$0xff]  ;;  %v237_v6 = vld [vmem:[%s216_s22 + $0x20] sm:$0xff]  ;;  %v238_v7 = vld [vmem:[%s216_s22 + $0x28] sm:$0xff]  ;;  %v245_v8 = vmul.f32 %v420_v0, %v233_v2  ;;  %v246_v9 = vmul.f32 %v420_v0, %v234_v3  ;;  %v247_v10 = vmul.f32 %v420_v0, %v235_v4 }
  0x11   : > { %v239_v11 = vld [vmem:[%s216_s22 + $0x30] sm:$0xff]  ;;  %v240_v12 = vld [vmem:[%s216_s22 + $0x38] sm:$0xff]  ;;  %v248_v13 = vmul.f32 %v420_v0, %v236_v5  ;;  %v249_v14 = vmul.f32 %v420_v0, %v237_v6  ;;  %v250_v15 = vmul.f32 %v420_v0, %v238_v7 }
  0x12   : > { %v251_v16 = vmul.f32 %v420_v0, %v239_v11  ;;  %v252_v17 = vmul.f32 %v420_v0, %v240_v12  ;;  %v257_v18 = vadd.f32 %v421_v1, %v245_v8  ;;  %v258_v19 = vadd.f32 %v421_v1, %v246_v9 }
  0x13   : > { %v259_v20 = vadd.f32 %v421_v1, %v247_v10  ;;  %v260_v21 = vadd.f32 %v421_v1, %v248_v13  ;;  %v261_v22 = vadd.f32 %v421_v1, %v249_v14  ;;  %v262_v23 = vadd.f32 %v421_v1, %v250_v15 }
  0x14   : > { %v263_v24 = vadd.f32 %v421_v1, %v251_v16  ;;  %v265_v25 = vmax.f32 %v257_v18, 0.0  ;;  %v266_v26 = vmax.f32 %v258_v19, 0.0  ;;  %v264_v27 = vadd.f32 %v421_v1, %v252_v17 }
  0x15   : > { %v267_v28 = vmax.f32 %v259_v20, 0.0  ;;  %v268_v29 = vmax.f32 %v260_v21, 0.0  ;;  %v269_v30 = vmax.f32 %v261_v22, 0.0  ;;  %v270_v31 = vmax.f32 %v262_v23, 0.0 }
  0x16   : > { %273 = vst [vmem:[%s231_s27] sm:$0xff] %v265_v25  ;;  %v271_v32 = vmax.f32 %v263_v24, 0.0  ;;  %v272_v33 = vmax.f32 %v264_v27, 0.0 }
  0x17   : > { %274 = vst [vmem:[%s231_s27 + $0x8] sm:$0xff] %v266_v26 }
  0x18   : > { %275 = vst [vmem:[%s231_s27 + $0x10] sm:$0xff] %v267_v28 }
  0x19   : > { %276 = vst [vmem:[%s231_s27 + $0x18] sm:$0xff] %v268_v29 }
  0x1a   : > { %277 = vst [vmem:[%s231_s27 + $0x20] sm:$0xff] %v269_v30 }
  0x1b   : > { %278 = vst [vmem:[%s231_s27 + $0x28] sm:$0xff] %v270_v31 }
  0x1c   : > { %279 = vst [vmem:[%s231_s27 + $0x30] sm:$0xff] %v271_v32 }
  0x1d   : > { %280 = vst [vmem:[%s231_s27 + $0x38] sm:$0xff] %v272_v33 }
  0x1e PF: > { %s13_s14 = sadd.s32 1, %s444_s14   ;;  %s509_s12 = smov %s440_s13 }
  0x1f   : > { %p10_p5 = scmp.ge.s32.totalorder %s13_s14, 4   ;;  %s510_s13 = smov %s512_s15 }
  0x21   :  { %12 = sbr.rel (!%p10_p5) target bundleno = 2 (0x2), region = 68 }

// kernel: conv_bn_relu.2
= control target key start
LH: loop header
LB: loop body
LE: loop exit
PB: predicated region body
PF: predicated region fallthrough
CT: control target
= control target key end

     0   :  { %s743_s15 = smov 0   ;;  %s745_s16 = smov 0   ;;  %s823_s0 = inlined_call_operand.vmem [shape: f32[16,2,8,8], index: 0, kind: input, shape index: {}]   ;;  %s824_s1 = inlined_call_operand.vmem [shape: f32[2,8,128], index: 1, kind: input, shape index: {}]   ;;  %s825_s2 = inlined_call_operand.vmem [shape: f32[128,128], index: 2, kind: output, shape index: {0}]   ;;  %s826_s3 = inlined_call_operand.vmem [shape: f32[2,1,128], index: 3, kind: output, shape index: {1}]   ;;  %s827_s4 = inlined_call_operand.vmem [shape: f32[2,1,128], index: 4, kind: output, shape index: {2}]  }
   0x1   :  { %s747_s17 = smov 0  }
   0x2 LB: > { %s27_s18 = sadd.s32 1, %s712_s16  ;;  %p634_p0 = scmp.ge.s32.totalorder %s716_s17, 1  ;;  %s716_s17 = sphi %s747_s17, %s15_s17   ;;  %s712_s16 = sphi %s745_s16, %s829_s16   ;;  %s708_s15 = sphi %s743_s15, %s828_s15  }
   0x3   : > { %p29_p1 = scmp.ge.s32.totalorder %s27_s18, 2  ;;  %p196_p2 = scmp.lt.s32.totalorder %s716_s17, 3 }
   0x5   : > { %s831_s18 = smov (%p29_p1, %s27_s18), 0  ;;  %p197_p3 = pnand %p634_p0, %p196_p2 }
   0x6   : > { %s635_s23 = sshll.u32 (!%p197_p3), %s708_s15, 3  ;;  %p262_p5 = scmp.lt.s32.totalorder (!%p197_p3), %s708_s15, 1 }
   0x7   : > { %200 = sbr.rel (%p197_p3) target bundleno = 193 (0xc1), region = 28  ;;  %p243_p4 = scmp.lt.s32.totalorder (!%p197_p3), %s635_s23, 15 }
   0xc   : > { %v648_v0 = vld [vmem:[%s824_s1 + $0x8] sm:$0xff]  ;;  %v282_v1 = vld [vmem:[%s824_s1] sm:$0xff]  ;;  %s833_s23 = smov (!%p243_p4, %s635_s23), 15  ;;  %vm294_vm0 = vcmask 64512   ;;  %s835_s15 = smov (!%p262_p5, %s708_s15), 1 }
   0xd   : > { %334 = vmatpush.msra.mxu0 %v648_v0  ;;  %399 = vmatpush.msra.mxu1 %v282_v1  ;;  %s667_s24 = sshll.u32 %s833_s23, 4  ;;  %s639_s28 = sshll.u32 %s833_s23, 3 }
   0xe   : > { %668 = vmatpush.msra.mxu2 %v648_v0  ;;  %669 = vmatpush.msra.mxu3 %v282_v1  ;;  %s247_s27 = scalar_lea.vmem %s823_s0, %s667_s24  ;;  %s796_s5 = scalar_lea.vmem %s825_s2, %s639_s28 }
   0xf   : > { %v640_v2 = vld [vmem:[%s247_s27 + $0x8] sm:$0xff]  ;;  %v274_v3 = vld [vmem:[%s247_s27] sm:$0xff]  ;;  %v641_v6 = vld [vmem:[%s247_s27 + $0x18] sm:$0xff]  ;;  %s267_s8 = scalar_lea.vmem %s826_s3, %s835_s15  ;;  %s273_s11 = scalar_lea.vmem %s827_s4, %s835_s15 }
  0x10   : > { %v644_v4 = vld [vmem:[%s247_s27 + $0x48] sm:$0xff]  ;;  %649 = vmatmul.msk.f32.vlgmr.msra.gmra.mxu0 %vm294_vm0, %v640_v2  ;;  %657 = vmatmul.msk.f32.vlgmr.msra.gmra.mxu1 %vm294_vm0, %v274_v3  ;;  %v278_v5 = vld [vmem:[%s247_s27 + $0x40] sm:$0xff]  ;;  %v275_v7 = vld [vmem:[%s247_s27 + $0x10] sm:$0xff] }
  0x11   : > { %653 = vmatmul.msk.f32.vlgmr.msra.gmra.mxu2 %vm294_vm0, %v644_v4  ;;  %661 = vmatmul.msk.f32.vlgmr.msra.gmra.mxu3 %vm294_vm0, %v278_v5  ;;  %v645_v8 = vld [vmem:[%s247_s27 + $0x58] sm:$0xff]  ;;  %v279_v9 = vld [vmem:[%s247_s27 + $0x50] sm:$0xff]  ;;  %v642_v10 = vld [vmem:[%s247_s27 + $0x28] sm:$0xff] }
  0x12   : > { %v276_v11 = vld [vmem:[%s247_s27 + $0x20] sm:$0xff]  ;;  %v646_v12 = vld [vmem:[%s247_s27 + $0x68] sm:$0xff]  ;;  %v643_v14 = vld [vmem:[%s247_s27 + $0x38] sm:$0xff] }
  0x13   : > { %v280_v13 = vld [vmem:[%s247_s27 + $0x60] sm:$0xff]  ;;  %v277_v15 = vld [vmem:[%s247_s27 + $0x30] sm:$0xff]  ;;  %v647_v16 = vld [vmem:[%s247_s27 + $0x78] sm:$0xff] }
  0x14   : > { %v281_v17 = vld [vmem:[%s247_s27 + $0x70] sm:$0xff] }
  0x18   : > { %650 = vmatmul.msk.f32.gmra.mxu0 %vm294_vm0, %v641_v6  ;;  %658 = vmatmul.msk.f32.gmra.mxu1 %vm294_vm0, %v275_v7 }
  0x19   : > { %654 = vmatmul.msk.f32.gmra.mxu2 %vm294_vm0, %v645_v8  ;;  %662 = vmatmul.msk.f32.gmra.mxu3 %vm294_vm0, %v279_v9 }
  0x20   : > { %651 = vmatmul.msk.f32.gmra.mxu0 %vm294_vm0, %v642_v10  ;;  %659 = vmatmul.msk.f32.gmra.mxu1 %vm294_vm0, %v276_v11 }
  0x21   : > { %655 = vmatmul.msk.f32.gmra.mxu2 %vm294_vm0, %v646_v12  ;;  %663 = vmatmul.msk.f32.gmra.mxu3 %vm294_vm0, %v280_v13 }
  0x28   : > { %652 = vmatmul.msk.f32.gmra.mxu0 %vm294_vm0, %v643_v14  ;;  %660 = vmatmul.msk.f32.gmra.mxu1 %vm294_vm0, %v277_v15 }
  0x29   : > { %656 = vmatmul.msk.f32.gmra.mxu2 %vm294_vm0, %v647_v16  ;;  %664 = vmatmul.msk.f32.gmra.mxu3 %vm294_vm0, %v281_v17 }
  0x8d   : > { %v336_v18 = vpop.f32.mrf.mxu0  ;;  %v401_v19 = vpop.f32.mrf.mxu1 }
  0x8e   : > { %v402_v20 = vadd.f32 %v401_v19, %v336_v18 }
  0x90   : > { %425 = vst [vmem:[%s796_s5] sm:$0xff] %v402_v20  ;;  %v447_v34 = vmul.f32 %v402_v20, %v402_v20 }
  0x94   : > { %v348_v21 = vpop.f32.mrf.mxu2  ;;  %v413_v22 = vpop.f32.mrf.mxu3 }
  0x95   : > { %v339_v23 = vpop.f32.mrf.mxu0  ;;  %v404_v24 = vpop.f32.mrf.mxu1  ;;  %v414_v25 = vadd.f32 %v413_v22, %v348_v21 }
  0x96   : > { %v405_v26 = vadd.f32 %v404_v24, %v339_v23 }
  0x97   : > { %429 = vst [vmem:[%s796_s5 + $0x20] sm:$0xff] %v414_v25  ;;  %v451_v48 = vmul.f32 %v414_v25, %v414_v25 }
  0x98   : > { %426 = vst [vmem:[%s796_s5 + $0x8] sm:$0xff] %v405_v26  ;;  %v448_v33 = vmul.f32 %v405_v26, %v405_v26  ;;  %v433_v35 = vadd.f32 %v405_v26, %v402_v20 }
  0x9a   : > { %v455_v42 = vadd.f32 %v448_v33, %v447_v34 }
  0x9c   : > { %v351_v27 = vpop.f32.mrf.mxu2  ;;  %v416_v28 = vpop.f32.mrf.mxu3 }
  0x9d   : > { %v342_v29 = vpop.f32.mrf.mxu0  ;;  %v407_v30 = vpop.f32.mrf.mxu1  ;;  %v417_v31 = vadd.f32 %v416_v28, %v351_v27 }
  0x9e   : > { %v408_v32 = vadd.f32 %v407_v30, %v342_v29 }
  0x9f   : > { %430 = vst [vmem:[%s796_s5 + $0x28] sm:$0xff] %v417_v31  ;;  %v452_v51 = vmul.f32 %v417_v31, %v417_v31 }
  0xa0   : > { %427 = vst [vmem:[%s796_s5 + $0x10] sm:$0xff] %v408_v32  ;;  %v449_v36 = vmul.f32 %v408_v32, %v408_v32  ;;  %v434_v43 = vadd.f32 %v433_v35, %v408_v32 }
  0xa2   : > { %v456_v45 = vadd.f32 %v455_v42, %v449_v36 }
  0xa4   : > { %v354_v37 = vpop.f32.mrf.mxu2  ;;  %v419_v38 = vpop.f32.mrf.mxu3 }
  0xa5   : > { %v345_v39 = vpop.f32.mrf.mxu0  ;;  %v410_v40 = vpop.f32.mrf.mxu1  ;;  %v420_v41 = vadd.f32 %v419_v38, %v354_v37 }
  0xa6   : > { %v411_v44 = vadd.f32 %v410_v40, %v345_v39 }
  0xa7   : > { %431 = vst [vmem:[%s796_s5 + $0x30] sm:$0xff] %v420_v41  ;;  %v453_v58 = vmul.f32 %v420_v41, %v420_v41 }
  0xa8   : > { %428 = vst [vmem:[%s796_s5 + $0x18] sm:$0xff] %v411_v44  ;;  %v435_v46 = vadd.f32 %v434_v43, %v411_v44  ;;  %v450_v47 = vmul.f32 %v411_v44, %v411_v44 }
  0xaa   : > { %v436_v49 = vadd.f32 %v435_v46, %v414_v25  ;;  %v457_v50 = vadd.f32 %v456_v45, %v450_v47 }
  0xac   : > { %v458_v52 = vadd.f32 %v457_v50, %v451_v48  ;;  %v437_v53 = vadd.f32 %v436_v49, %v417_v31  ;;  %v357_v54 = vpop.f32.mrf.mxu2  ;;  %v422_v55 = vpop.f32.mrf.mxu3 }
  0xad   : > { %v423_v56 = vadd.f32 %v422_v55, %v357_v54 }
  0xae   : > { %v438_v57 = vadd.f32 %v437_v53, %v420_v41  ;;  %v459_v59 = vadd.f32 %v458_v52, %v452_v51 }
  0xaf   : > { %432 = vst [vmem:[%s796_s5 + $0x38] sm:$0xff] %v423_v56  ;;  %v454_v60 = vmul.f32 %v423_v56, %v423_v56 }
  0xb0   : > { %v460_v61 = vadd.f32 %v459_v59, %v453_v58  ;;  %v439_v62 = vadd.f32 %v438_v57, %v423_v56 }
  0xb2   : > { %v440_v63 = vrot.slane %v439_v62, 4  ;;  %v461_v0 = vadd.f32 %v460_v61, %v454_v60 }
  0xb4   : > { %v441_v1 = vadd.f32 %v440_v63, %v439_v62  ;;  %v462_v2 = vrot.slane %v461_v0, 4 }
  0xb6   : > { %v442_v3 = vrot.slane %v441_v1, 2  ;;  %v463_v4 = vadd.f32 %v462_v2, %v461_v0 }
  0xb8   : > { %v443_v5 = vadd.f32 %v442_v3, %v441_v1  ;;  %v464_v6 = vrot.slane %v463_v4, 2 }
  0xba   : > { %v444_v7 = vrot.slane %v443_v5, 1  ;;  %v465_v8 = vadd.f32 %v464_v6, %v463_v4 }
  0xbc   : > { %v445_v9 = vadd.f32 %v444_v7, %v443_v5  ;;  %v466_v10 = vrot.slane %v465_v8, 1 }
  0xbe   : > { %446 = vst [vmem:[%s267_s8] sm:$0x1] %v445_v9  ;;  %v467_v11 = vadd.f32 %v466_v10, %v465_v8 }
  0xc0   : > { %468 = vst [vmem:[%s273_s11] sm:$0x1] %v467_v11 }
  0xc1 PF: > { %s15_s17 = sadd.s32 1, %s716_s17   ;;  %s828_s15 = smov %s712_s16 }
  0xc2   : > { %p12_p6 = scmp.ge.s32.totalorder %s15_s17, 4   ;;  %s829_s16 = smov %s831_s18 }
  0xc4   :  { %14 = sbr.rel (!%p12_p6) target bundleno = 2 (0x2), region = 87 }

</bundles_post_ra>
